<compile_context>
chip_gen: v7x
topology: tpu7x:2x2x1
jax: 0.10.0
libtpu: 0.0.40
codegen_flags: <defaults>
</compile_context>

<pallas_src>
import functools

import jax
import jax.numpy as jnp
from jax.experimental import pallas as pl
from jax.experimental.pallas import tpu as pltpu  # noqa: F401  (TPU backend)

# ----------------------------- configuration ---------------------------------
N = 16           # number of graph nodes
E = 32           # number of edges (unique, no self-loops in the input graph)
EDGE_DIM = 4     # edge_attr feature dim
ECONV_IN = 8     # EConv_in_channels
ECONV_OUT = 16   # EConv_out_channels
MLP_HIDDEN = 32  # hidden width of EConv_mlp (Linear -> ReLU -> Linear)
GAT_OUT = (16, 8)  # GAT_out_channels
HEADS = 2          # GAT_N_heads
SLAB_COLS = 128    # lane width of the packed slabs
# dropout = 0.0 (eval)


# --------------------------- slab layouts (static) ----------------------------
def _build_layout(entries):
    """entries: [(name, rows, cols)] -> ({name: (row_off, rows, cols)}, total_rows).
    Row offsets are 8-aligned so every in-kernel slice is sublane-aligned."""
    layout, off = {}, 0
    for name, r, c in entries:
        layout[name] = (off, r, c)
        off += ((r + 7) // 8) * 8
    return layout, off


_PARAM_ENTRIES = [
    ("mlp_w1", EDGE_DIM, MLP_HIDDEN),
    ("mlp_b1", 1, MLP_HIDDEN),
    ("mlp_w2", MLP_HIDDEN, ECONV_IN * ECONV_OUT),
    ("mlp_b2", 1, ECONV_IN * ECONV_OUT),
    ("root", ECONV_IN, ECONV_OUT),
    ("econv_bias", 1, ECONV_OUT),
    ("sel", ECONV_IN * ECONV_OUT, ECONV_OUT),     # constant selection matrix
]
_in_dim = ECONV_OUT
for _li, _c in enumerate(GAT_OUT):
    _PARAM_ENTRIES += [
        (f"gat{_li}_w", _in_dim, HEADS * _c),
        (f"gat{_li}_asrc", HEADS, HEADS * _c),     # block-diagonal att_src, transposed
        (f"gat{_li}_adst", HEADS * _c, HEADS),     # block-diagonal att_dst
        (f"gat{_li}_bias", 1, _c),
    ]
    _in_dim = _c
PARAM_LAYOUT, PARAM_ROWS = _build_layout(_PARAM_ENTRIES)

_DATA_ENTRIES = [
    ("edge_attr", E, EDGE_DIM),
    ("xsrc_rep", E, ECONV_IN * ECONV_OUT),
    ("scat", N, E),
    ("x", N, ECONV_IN),
    ("adj", N, N),
]
DATA_LAYOUT, DATA_ROWS = _build_layout(_DATA_ENTRIES)


def pack_slab(layout, rows, arrays):
    slab = jnp.zeros((rows, SLAB_COLS), jnp.float32)
    for name, arr in arrays.items():
        o, r, c = layout[name]
        slab = slab.at[o:o + r, :c].set(arr.astype(jnp.float32).reshape(r, c))
    return slab


# ------------------------------ fused Pallas kernel ---------------------------
def fused_graph_embedder_kernel(p_ref, d_ref, o_ref, *, fin, fout, heads, gat_dims):
    """NNConv (aggr='add', root, bias) followed by all GAT layers, fully in VMEM.

    p_ref: [PARAM_ROWS, 128]  packed parameters + constant selection matrix
    d_ref: [DATA_ROWS, 128]   packed per-call data (edge_attr, xsrc_rep, scat, x, adj)
    o_ref: [N, gat_dims[-1]]
    """
    def P(name):
        o, r, c = PARAM_LAYOUT[name]
        return p_ref[o:o + r, :c]

    def D(name):
        o, r, c = DATA_LAYOUT[name]
        return d_ref[o:o + r, :c]

    # ----- NNConv: theta[e] = mlp(edge_attr[e]) -> flattened [E, fin*fout] -----
    h1 = jnp.dot(D("edge_attr"), P("mlp_w1"), preferred_element_type=jnp.float32) + P("mlp_b1")
    h1 = jnp.maximum(h1, 0.0)
    theta = jnp.dot(h1, P("mlp_w2"), preferred_element_type=jnp.float32) + P("mlp_b2")

    # m[e, j] = sum_k x_src[e, k] * theta[e, k*fout + j]
    #         = ((xsrc_rep * theta) @ sel)[e, j]   with sel[k*fout + j, j] = 1
    prod = D("xsrc_rep") * theta                                        # [E, fin*fout] vreg-wide
    m = jnp.dot(prod, P("sel"), preferred_element_type=jnp.float32)     # [E, fout]

    # scatter-add to target nodes (dense one-hot matmul) + root term + bias
    agg = jnp.dot(D("scat"), m, preferred_element_type=jnp.float32)     # [N, fout]
    out = (agg
           + jnp.dot(D("x"), P("root"), preferred_element_type=jnp.float32)
           + P("econv_bias"))

    adj = D("adj")                                                      # [N, N], self-loops incl.
    edge_mask = adj > 0.0

    # ----- GAT layers: heads=H, concat=False (mean), LeakyReLU(0.2), softmax, bias -----
    for li, c in enumerate(gat_dims):
        h = jnp.dot(out, P(f"gat{li}_w"), preferred_element_type=jnp.float32)   # [N, H*C]
        # all-head attention scores with two matmuls (block-diagonal att vectors)
        a_src = jax.lax.dot_general(P(f"gat{li}_asrc"), h, (((1,), (1,)), ((), ())),
                                    preferred_element_type=jnp.float32)          # [H, N]
        a_dst = jnp.dot(h, P(f"gat{li}_adst"), preferred_element_type=jnp.float32)  # [N, H]

        acc = jnp.zeros((out.shape[0], c), jnp.float32)
        for hh in range(heads):                                   # static unroll, H=2
            hd = h[:, hh * c:(hh + 1) * c]                        # [N, C]
            logits = a_dst[:, hh:hh + 1] + a_src[hh:hh + 1, :]    # [N, N]: logits[i, j]
            logits = jnp.where(logits > 0, logits, 0.2 * logits)  # LeakyReLU(0.2)
            logits = jnp.where(edge_mask, logits, -1e30)          # mask non-edges
            mmax = jnp.max(logits, axis=1, keepdims=True)
            p = jnp.exp(logits - mmax)
            p = jnp.where(edge_mask, p, 0.0)
            # softmax normalisation with 1/heads mean folded in (EUP reciprocal + VPU mul)
            inv = pl.reciprocal(jnp.sum(p, axis=1, keepdims=True) * float(heads),
                                approx=False)
            acc = acc + jnp.dot(p * inv, hd, preferred_element_type=jnp.float32)
        out = acc + P(f"gat{li}_bias")

    o_ref[...] = out


def _fused_call(param_slab, data_slab, n_nodes, out_dim):
    kernel = functools.partial(fused_graph_embedder_kernel,
                               fin=ECONV_IN, fout=ECONV_OUT,
                               heads=HEADS, gat_dims=GAT_OUT)
    # Single program, whole arrays resident in VMEM (no grid -> one pipeline step).
    return pl.pallas_call(
        kernel,
        out_shape=jax.ShapeDtypeStruct((n_nodes, out_dim), jnp.float32),
    )(param_slab, data_slab)


# ----------------------------- parameter handling ------------------------------
def init_params(key):
    ks = jax.random.split(key, 16)
    params = {
        "mlp_w1": 0.2 * jax.random.normal(ks[0], (EDGE_DIM, MLP_HIDDEN), jnp.float32),
        "mlp_b1": 0.1 * jax.random.normal(ks[1], (1, MLP_HIDDEN), jnp.float32),
        "mlp_w2": 0.2 * jax.random.normal(ks[2], (MLP_HIDDEN, ECONV_IN * ECONV_OUT), jnp.float32),
        "mlp_b2": 0.1 * jax.random.normal(ks[3], (1, ECONV_IN * ECONV_OUT), jnp.float32),
        "root": 0.2 * jax.random.normal(ks[4], (ECONV_IN, ECONV_OUT), jnp.float32),
        "econv_bias": 0.1 * jax.random.normal(ks[5], (1, ECONV_OUT), jnp.float32),
        "gat": [],
    }
    in_dim = ECONV_OUT
    ki = 6
    for c in GAT_OUT:
        params["gat"].append({
            "w": 0.2 * jax.random.normal(ks[ki], (in_dim, HEADS * c), jnp.float32),
            "att_src": 0.2 * jax.random.normal(ks[ki + 1], (HEADS, c), jnp.float32),
            "att_dst": 0.2 * jax.random.normal(ks[ki + 2], (HEADS, c), jnp.float32),
            "bias": 0.1 * jax.random.normal(ks[ki + 3], (1, c), jnp.float32),
        })
        in_dim = c
        ki += 4
    return params


def pack_params(params):
    """Pack all parameters + constants into one [PARAM_ROWS, 128] f32 slab (done once)."""
    # selection matrix S[k*fout + j, j] = 1
    sel = jnp.tile(jnp.eye(ECONV_OUT, dtype=jnp.float32), (ECONV_IN, 1))
    arrays = {
        "mlp_w1": params["mlp_w1"], "mlp_b1": params["mlp_b1"],
        "mlp_w2": params["mlp_w2"], "mlp_b2": params["mlp_b2"],
        "root": params["root"], "econv_bias": params["econv_bias"],
        "sel": sel,
    }
    for li, lp in enumerate(params["gat"]):
        c = lp["bias"].shape[1]
        asrc_t = jnp.zeros((HEADS, HEADS * c), jnp.float32)   # [H, H*C] transposed block-diag
        adst = jnp.zeros((HEADS * c, HEADS), jnp.float32)     # [H*C, H] block-diag
        for hh in range(HEADS):
            asrc_t = asrc_t.at[hh, hh * c:(hh + 1) * c].set(lp["att_src"][hh])
            adst = adst.at[hh * c:(hh + 1) * c, hh].set(lp["att_dst"][hh])
        arrays[f"gat{li}_w"] = lp["w"]
        arrays[f"gat{li}_asrc"] = asrc_t
        arrays[f"gat{li}_adst"] = adst
        arrays[f"gat{li}_bias"] = lp["bias"]
    return pack_slab(PARAM_LAYOUT, PARAM_ROWS, arrays)


# ------------------------------- jitted forward --------------------------------
@jax.jit
def graph_node_embedder_forward(x, edge_index, edge_attr, param_slab):
    src, tgt = edge_index[0], edge_index[1]
    n = x.shape[0]

    # glue (fused under jit): gather + repeat, dense scatter matrix, adjacency w/ self-loops
    x_src = x[src]                                                     # [E, Fin]
    xsrc_rep = jnp.repeat(x_src, ECONV_OUT, axis=1)                    # [E, Fin*Fout]
    scat = jnp.transpose(jax.nn.one_hot(tgt, n, dtype=jnp.float32))    # [N, E]
    adj = jnp.zeros((n, n), jnp.float32).at[tgt, src].set(1.0)
    adj = jnp.maximum(adj, jnp.eye(n, dtype=jnp.float32))              # add self loops

    data_slab = pack_slab(DATA_LAYOUT, DATA_ROWS, {
        "edge_attr": edge_attr, "xsrc_rep": xsrc_rep,
        "scat": scat, "x": x, "adj": adj,
    })
    return _fused_call(param_slab, data_slab, n, GAT_OUT[-1])


# ----------------------------- pure-JAX reference (sparse semantics) -----------
def reference_forward(x, edge_index, edge_attr, params):
    src, tgt = edge_index[0], edge_index[1]
    n = x.shape[0]
    # NNConv
    h1 = jnp.maximum(edge_attr @ params["mlp_w1"] + params["mlp_b1"], 0.0)
    theta = (h1 @ params["mlp_w2"] + params["mlp_b2"]).reshape(-1, ECONV_IN, ECONV_OUT)
    m = jnp.einsum("ek,eko->eo", x[src], theta)
    agg = jnp.zeros((n, ECONV_OUT), jnp.float32).at[tgt].add(m)
    out = agg + x @ params["root"] + params["econv_bias"]
    # GAT layers (edge-list segment softmax, exact PyG semantics)
    loop = jnp.arange(n)
    es = jnp.concatenate([src, loop])
    et = jnp.concatenate([tgt, loop])
    for lp in params["gat"]:
        c = lp["bias"].shape[1]
        h = (out @ lp["w"]).reshape(n, HEADS, c)
        a_s = (h * lp["att_src"][None]).sum(-1)      # [N, H]
        a_d = (h * lp["att_dst"][None]).sum(-1)
        alpha = a_s[es] + a_d[et]
        alpha = jnp.where(alpha > 0, alpha, 0.2 * alpha)
        amax = jnp.full((n, HEADS), -jnp.inf).at[et].max(alpha)
        ex = jnp.exp(alpha - amax[et])
        denom = jnp.zeros((n, HEADS), jnp.float32).at[et].add(ex)
        attn = ex / denom[et]
        msg = h[es] * attn[:, :, None]
        o = jnp.zeros((n, HEADS, c), jnp.float32).at[et].add(msg)
        out = o.mean(axis=1) + lp["bias"][0]
    return out


# ----------------------------------- main ---------------------------------------
if __name__ == "__main__":
    key = jax.random.PRNGKey(0)
    kx, ke, kp = jax.random.split(key, 3)

    # deterministic unique edge list (two rings), no self loops, no duplicates
    base = jnp.arange(N, dtype=jnp.int32)
    src = jnp.concatenate([base, base])
    tgt = jnp.concatenate([(base + 1) % N, (base + 3) % N])
    edge_index = jnp.stack([src, tgt]).astype(jnp.int32)          # [2, E]

    # dense one-hot/adjacency formulation requires a simple graph (no duplicate edges)
    assert int(jnp.unique(src * N + tgt).size) == E, "duplicate edges not supported"

    x = jax.random.normal(kx, (N, ECONV_IN), jnp.float32)
    edge_attr = jax.random.normal(ke, (E, EDGE_DIM), jnp.float32)
    params = init_params(kp)
    param_slab = pack_params(params)              # packed once, reused across calls

    out = graph_node_embedder_forward(x, edge_index, edge_attr, param_slab)
    out = jax.block_until_ready(out)

    ref = reference_forward(x, edge_index, edge_attr, params)
    assert out.shape == (N, GAT_OUT[-1])
    assert jnp.allclose(out, ref, rtol=1e-4, atol=1e-4), (
        f"max abs err = {jnp.max(jnp.abs(out - ref))}")

    print("KERNEL_OK")
</pallas_src>

<mosaic_0001>
module attributes {stable_mosaic.version = 11 : i64} {
  func.func @fused_graph_embedder_kernel(%arg0: memref<312x128xf32, #tpu.memory_space<vmem>>, %arg1: memref<112x128xf32, #tpu.memory_space<vmem>>, %arg2: memref<16x8xf32, #tpu.memory_space<vmem>>) attributes {dimension_semantics = [], scalar_prefetch = 0 : i64, scratch_operands = 0 : i64, tpu.core_type = #tpu.core_type<tc>} {
    %c0 = arith.constant 0 : index
    %c0_0 = arith.constant 0 : index
    %0 = vector.load %arg1[%c0, %c0_0] : memref<112x128xf32, #tpu.memory_space<vmem>>, vector<32x4xf32>
    %c0_1 = arith.constant 0 : index
    %c0_2 = arith.constant 0 : index
    %1 = vector.load %arg0[%c0_1, %c0_2] : memref<312x128xf32, #tpu.memory_space<vmem>>, vector<4x32xf32>
    %cst = arith.constant dense<0.000000e+00> : vector<32x32xf32>
    %2 = tpu.matmul %0, %1, %cst {dimension_numbers = #tpu.dot_dimension_numbers<[1], [0], [0], [1], [0, 0, 1, 1], [], []>} : vector<32x4xf32>, vector<4x32xf32>, vector<32x32xf32> -> vector<32x32xf32>
    %c8 = arith.constant 8 : index
    %c0_3 = arith.constant 0 : index
    %3 = vector.load %arg0[%c8, %c0_3] : memref<312x128xf32, #tpu.memory_space<vmem>>, vector<1x32xf32>
    %4 = vector.broadcast %3 : vector<1x32xf32> to vector<32x32xf32>
    %5 = arith.addf %2, %4 : vector<32x32xf32>
    %cst_4 = arith.constant 0.000000e+00 : f32
    %6 = vector.broadcast %cst_4 : f32 to vector<32x32xf32>
    %7 = arith.maximumf %5, %6 : vector<32x32xf32>
    %c16 = arith.constant 16 : index
    %c0_5 = arith.constant 0 : index
    %8 = vector.load %arg0[%c16, %c0_5] : memref<312x128xf32, #tpu.memory_space<vmem>>, vector<32x128xf32>
    %cst_6 = arith.constant dense<0.000000e+00> : vector<32x128xf32>
    %9 = tpu.matmul %7, %8, %cst_6 {dimension_numbers = #tpu.dot_dimension_numbers<[1], [0], [0], [1], [0, 0, 1, 1], [], []>} : vector<32x32xf32>, vector<32x128xf32>, vector<32x128xf32> -> vector<32x128xf32>
    %c48 = arith.constant 48 : index
    %c0_7 = arith.constant 0 : index
    %10 = vector.load %arg0[%c48, %c0_7] : memref<312x128xf32, #tpu.memory_space<vmem>>, vector<1x128xf32>
    %11 = vector.broadcast %10 : vector<1x128xf32> to vector<32x128xf32>
    %12 = arith.addf %9, %11 : vector<32x128xf32>
    %c32 = arith.constant 32 : index
    %c0_8 = arith.constant 0 : index
    %13 = vector.load %arg1[%c32, %c0_8] : memref<112x128xf32, #tpu.memory_space<vmem>>, vector<32x128xf32>
    %14 = arith.mulf %13, %12 : vector<32x128xf32>
    %c72 = arith.constant 72 : index
    %c0_9 = arith.constant 0 : index
    %15 = vector.load %arg0[%c72, %c0_9] : memref<312x128xf32, #tpu.memory_space<vmem>>, vector<128x16xf32>
    %cst_10 = arith.constant dense<0.000000e+00> : vector<32x16xf32>
    %16 = tpu.matmul %14, %15, %cst_10 {dimension_numbers = #tpu.dot_dimension_numbers<[1], [0], [0], [1], [0, 0, 1, 1], [], []>} : vector<32x128xf32>, vector<128x16xf32>, vector<32x16xf32> -> vector<32x16xf32>
    %c64 = arith.constant 64 : index
    %c0_11 = arith.constant 0 : index
    %17 = vector.load %arg1[%c64, %c0_11] : memref<112x128xf32, #tpu.memory_space<vmem>>, vector<16x32xf32>
    %cst_12 = arith.constant dense<0.000000e+00> : vector<16x16xf32>
    %18 = tpu.matmul %17, %16, %cst_12 {dimension_numbers = #tpu.dot_dimension_numbers<[1], [0], [0], [1], [0, 0, 1, 1], [], []>} : vector<16x32xf32>, vector<32x16xf32>, vector<16x16xf32> -> vector<16x16xf32>
    %c80 = arith.constant 80 : index
    %c0_13 = arith.constant 0 : index
    %19 = vector.load %arg1[%c80, %c0_13] : memref<112x128xf32, #tpu.memory_space<vmem>>, vector<16x8xf32>
    %c56 = arith.constant 56 : index
    %c0_14 = arith.constant 0 : index
    %20 = vector.load %arg0[%c56, %c0_14] : memref<312x128xf32, #tpu.memory_space<vmem>>, vector<8x16xf32>
    %cst_15 = arith.constant dense<0.000000e+00> : vector<16x16xf32>
    %21 = tpu.matmul %19, %20, %cst_15 {dimension_numbers = #tpu.dot_dimension_numbers<[1], [0], [0], [1], [0, 0, 1, 1], [], []>} : vector<16x8xf32>, vector<8x16xf32>, vector<16x16xf32> -> vector<16x16xf32>
    %22 = arith.addf %18, %21 : vector<16x16xf32>
    %c64_16 = arith.constant 64 : index
    %c0_17 = arith.constant 0 : index
    %23 = vector.load %arg0[%c64_16, %c0_17] : memref<312x128xf32, #tpu.memory_space<vmem>>, vector<1x16xf32>
    %24 = vector.broadcast %23 : vector<1x16xf32> to vector<16x16xf32>
    %25 = arith.addf %22, %24 : vector<16x16xf32>
    %c96 = arith.constant 96 : index
    %c0_18 = arith.constant 0 : index
    %26 = vector.load %arg1[%c96, %c0_18] : memref<112x128xf32, #tpu.memory_space<vmem>>, vector<16x16xf32>
    %cst_19 = arith.constant 0.000000e+00 : f32
    %27 = vector.broadcast %cst_19 : f32 to vector<16x16xf32>
    %28 = arith.cmpf ogt, %26, %27 : vector<16x16xf32>
    %c200 = arith.constant 200 : index
    %c0_20 = arith.constant 0 : index
    %29 = vector.load %arg0[%c200, %c0_20] : memref<312x128xf32, #tpu.memory_space<vmem>>, vector<16x32xf32>
    %cst_21 = arith.constant dense<0.000000e+00> : vector<16x32xf32>
    %30 = tpu.matmul %25, %29, %cst_21 {dimension_numbers = #tpu.dot_dimension_numbers<[1], [0], [0], [1], [0, 0, 1, 1], [], []>} : vector<16x16xf32>, vector<16x32xf32>, vector<16x32xf32> -> vector<16x32xf32>
    %c216 = arith.constant 216 : index
    %c0_22 = arith.constant 0 : index
    %31 = vector.load %arg0[%c216, %c0_22] : memref<312x128xf32, #tpu.memory_space<vmem>>, vector<2x32xf32>
    %cst_23 = arith.constant dense<0.000000e+00> : vector<2x16xf32>
    %32 = tpu.matmul %31, %30, %cst_23 {dimension_numbers = #tpu.dot_dimension_numbers<[1], [1], [0], [0], [0, 0, 1, 0], [], []>} : vector<2x32xf32>, vector<16x32xf32>, vector<2x16xf32> -> vector<2x16xf32>
    %c224 = arith.constant 224 : index
    %c0_24 = arith.constant 0 : index
    %33 = vector.load %arg0[%c224, %c0_24] : memref<312x128xf32, #tpu.memory_space<vmem>>, vector<32x2xf32>
    %cst_25 = arith.constant dense<0.000000e+00> : vector<16x2xf32>
    %34 = tpu.matmul %30, %33, %cst_25 {dimension_numbers = #tpu.dot_dimension_numbers<[1], [0], [0], [1], [0, 0, 1, 1], [], []>} : vector<16x32xf32>, vector<32x2xf32>, vector<16x2xf32> -> vector<16x2xf32>
    %cst_26 = arith.constant 0.000000e+00 : f32
    %35 = vector.broadcast %cst_26 : f32 to vector<16x16xf32>
    %36 = vector.extract_strided_slice %30 {offsets = [0, 0], sizes = [16, 16], strides = [1, 1]} : vector<16x32xf32> to vector<16x16xf32>
    %37 = vector.extract_strided_slice %34 {offsets = [0, 0], sizes = [16, 1], strides = [1, 1]} : vector<16x2xf32> to vector<16x1xf32>
    %38 = vector.extract_strided_slice %32 {offsets = [0, 0], sizes = [1, 16], strides = [1, 1]} : vector<2x16xf32> to vector<1x16xf32>
    %39 = vector.broadcast %37 : vector<16x1xf32> to vector<16x16xf32>
    %40 = vector.broadcast %38 : vector<1x16xf32> to vector<16x16xf32>
    %41 = arith.addf %39, %40 : vector<16x16xf32>
    %cst_27 = arith.constant 0.000000e+00 : f32
    %42 = vector.broadcast %cst_27 : f32 to vector<16x16xf32>
    %43 = arith.cmpf ogt, %41, %42 : vector<16x16xf32>
    %cst_28 = arith.constant 2.000000e-01 : f32
    %44 = vector.broadcast %cst_28 : f32 to vector<16x16xf32>
    %45 = arith.mulf %44, %41 : vector<16x16xf32>
    %46 = arith.select %43, %41, %45 : vector<16x16xi1>, vector<16x16xf32>
    %cst_29 = arith.constant -1.000000e+30 : f32
    %47 = vector.broadcast %cst_29 : f32 to vector<16x16xf32>
    %48 = arith.select %28, %46, %47 : vector<16x16xi1>, vector<16x16xf32>
    %cst_30 = arith.constant dense<0xFF800000> : vector<16xf32>
    %49 = vector.multi_reduction <maximumf>, %48, %cst_30 [1] : vector<16x16xf32> to vector<16xf32>
    %50 = vector.shape_cast %49 : vector<16xf32> to vector<16x1xf32>
    %51 = vector.broadcast %50 : vector<16x1xf32> to vector<16x16xf32>
    %52 = arith.subf %48, %51 : vector<16x16xf32>
    %53 = math.exp %52 : vector<16x16xf32>
    %cst_31 = arith.constant 0.000000e+00 : f32
    %54 = vector.broadcast %cst_31 : f32 to vector<16x16xf32>
    %55 = arith.select %28, %53, %54 : vector<16x16xi1>, vector<16x16xf32>
    %cst_32 = arith.constant dense<0.000000e+00> : vector<16xf32>
    %56 = vector.multi_reduction <add>, %55, %cst_32 [1] : vector<16x16xf32> to vector<16xf32>
    %57 = vector.shape_cast %56 : vector<16xf32> to vector<16x1xf32>
    %cst_33 = arith.constant 2.000000e+00 : f32
    %58 = vector.broadcast %cst_33 : f32 to vector<16x1xf32>
    %59 = arith.mulf %57, %58 : vector<16x1xf32>
    %60 = tpu.reciprocal %59 : vector<16x1xf32> -> vector<16x1xf32>
    %61 = vector.broadcast %60 : vector<16x1xf32> to vector<16x16xf32>
    %62 = arith.mulf %55, %61 : vector<16x16xf32>
    %cst_34 = arith.constant dense<0.000000e+00> : vector<16x16xf32>
    %63 = tpu.matmul %62, %36, %cst_34 {dimension_numbers = #tpu.dot_dimension_numbers<[1], [0], [0], [1], [0, 0, 1, 1], [], []>} : vector<16x16xf32>, vector<16x16xf32>, vector<16x16xf32> -> vector<16x16xf32>
    %64 = arith.addf %35, %63 : vector<16x16xf32>
    %65 = vector.extract_strided_slice %30 {offsets = [0, 16], sizes = [16, 16], strides = [1, 1]} : vector<16x32xf32> to vector<16x16xf32>
    %66 = vector.extract_strided_slice %34 {offsets = [0, 1], sizes = [16, 1], strides = [1, 1]} : vector<16x2xf32> to vector<16x1xf32>
    %67 = vector.extract_strided_slice %32 {offsets = [1, 0], sizes = [1, 16], strides = [1, 1]} : vector<2x16xf32> to vector<1x16xf32>
    %68 = vector.broadcast %66 : vector<16x1xf32> to vector<16x16xf32>
    %69 = vector.broadcast %67 : vector<1x16xf32> to vector<16x16xf32>
    %70 = arith.addf %68, %69 : vector<16x16xf32>
    %cst_35 = arith.constant 0.000000e+00 : f32
    %71 = vector.broadcast %cst_35 : f32 to vector<16x16xf32>
    %72 = arith.cmpf ogt, %70, %71 : vector<16x16xf32>
    %cst_36 = arith.constant 2.000000e-01 : f32
    %73 = vector.broadcast %cst_36 : f32 to vector<16x16xf32>
    %74 = arith.mulf %73, %70 : vector<16x16xf32>
    %75 = arith.select %72, %70, %74 : vector<16x16xi1>, vector<16x16xf32>
    %cst_37 = arith.constant -1.000000e+30 : f32
    %76 = vector.broadcast %cst_37 : f32 to vector<16x16xf32>
    %77 = arith.select %28, %75, %76 : vector<16x16xi1>, vector<16x16xf32>
    %cst_38 = arith.constant dense<0xFF800000> : vector<16xf32>
    %78 = vector.multi_reduction <maximumf>, %77, %cst_38 [1] : vector<16x16xf32> to vector<16xf32>
    %79 = vector.shape_cast %78 : vector<16xf32> to vector<16x1xf32>
    %80 = vector.broadcast %79 : vector<16x1xf32> to vector<16x16xf32>
    %81 = arith.subf %77, %80 : vector<16x16xf32>
    %82 = math.exp %81 : vector<16x16xf32>
    %cst_39 = arith.constant 0.000000e+00 : f32
    %83 = vector.broadcast %cst_39 : f32 to vector<16x16xf32>
    %84 = arith.select %28, %82, %83 : vector<16x16xi1>, vector<16x16xf32>
    %cst_40 = arith.constant dense<0.000000e+00> : vector<16xf32>
    %85 = vector.multi_reduction <add>, %84, %cst_40 [1] : vector<16x16xf32> to vector<16xf32>
    %86 = vector.shape_cast %85 : vector<16xf32> to vector<16x1xf32>
    %cst_41 = arith.constant 2.000000e+00 : f32
    %87 = vector.broadcast %cst_41 : f32 to vector<16x1xf32>
    %88 = arith.mulf %86, %87 : vector<16x1xf32>
    %89 = tpu.reciprocal %88 : vector<16x1xf32> -> vector<16x1xf32>
    %90 = vector.broadcast %89 : vector<16x1xf32> to vector<16x16xf32>
    %91 = arith.mulf %84, %90 : vector<16x16xf32>
    %cst_42 = arith.constant dense<0.000000e+00> : vector<16x16xf32>
    %92 = tpu.matmul %91, %65, %cst_42 {dimension_numbers = #tpu.dot_dimension_numbers<[1], [0], [0], [1], [0, 0, 1, 1], [], []>} : vector<16x16xf32>, vector<16x16xf32>, vector<16x16xf32> -> vector<16x16xf32>
    %93 = arith.addf %64, %92 : vector<16x16xf32>
    %c256 = arith.constant 256 : index
    %c0_43 = arith.constant 0 : index
    %94 = vector.load %arg0[%c256, %c0_43] : memref<312x128xf32, #tpu.memory_space<vmem>>, vector<1x16xf32>
    %95 = vector.broadcast %94 : vector<1x16xf32> to vector<16x16xf32>
    %96 = arith.addf %93, %95 : vector<16x16xf32>
    %c264 = arith.constant 264 : index
    %c0_44 = arith.constant 0 : index
    %97 = vector.load %arg0[%c264, %c0_44] : memref<312x128xf32, #tpu.memory_space<vmem>>, vector<16x16xf32>
    %cst_45 = arith.constant dense<0.000000e+00> : vector<16x16xf32>
    %98 = tpu.matmul %96, %97, %cst_45 {dimension_numbers = #tpu.dot_dimension_numbers<[1], [0], [0], [1], [0, 0, 1, 1], [], []>} : vector<16x16xf32>, vector<16x16xf32>, vector<16x16xf32> -> vector<16x16xf32>
    %c280 = arith.constant 280 : index
    %c0_46 = arith.constant 0 : index
    %99 = vector.load %arg0[%c280, %c0_46] : memref<312x128xf32, #tpu.memory_space<vmem>>, vector<2x16xf32>
    %cst_47 = arith.constant dense<0.000000e+00> : vector<2x16xf32>
    %100 = tpu.matmul %99, %98, %cst_47 {dimension_numbers = #tpu.dot_dimension_numbers<[1], [1], [0], [0], [0, 0, 1, 0], [], []>} : vector<2x16xf32>, vector<16x16xf32>, vector<2x16xf32> -> vector<2x16xf32>
    %c288 = arith.constant 288 : index
    %c0_48 = arith.constant 0 : index
    %101 = vector.load %arg0[%c288, %c0_48] : memref<312x128xf32, #tpu.memory_space<vmem>>, vector<16x2xf32>
    %cst_49 = arith.constant dense<0.000000e+00> : vector<16x2xf32>
    %102 = tpu.matmul %98, %101, %cst_49 {dimension_numbers = #tpu.dot_dimension_numbers<[1], [0], [0], [1], [0, 0, 1, 1], [], []>} : vector<16x16xf32>, vector<16x2xf32>, vector<16x2xf32> -> vector<16x2xf32>
    %cst_50 = arith.constant 0.000000e+00 : f32
    %103 = vector.broadcast %cst_50 : f32 to vector<16x8xf32>
    %104 = vector.extract_strided_slice %98 {offsets = [0, 0], sizes = [16, 8], strides = [1, 1]} : vector<16x16xf32> to vector<16x8xf32>
    %105 = vector.extract_strided_slice %102 {offsets = [0, 0], sizes = [16, 1], strides = [1, 1]} : vector<16x2xf32> to vector<16x1xf32>
    %106 = vector.extract_strided_slice %100 {offsets = [0, 0], sizes = [1, 16], strides = [1, 1]} : vector<2x16xf32> to vector<1x16xf32>
    %107 = vector.broadcast %105 : vector<16x1xf32> to vector<16x16xf32>
    %108 = vector.broadcast %106 : vector<1x16xf32> to vector<16x16xf32>
    %109 = arith.addf %107, %108 : vector<16x16xf32>
    %cst_51 = arith.constant 0.000000e+00 : f32
    %110 = vector.broadcast %cst_51 : f32 to vector<16x16xf32>
    %111 = arith.cmpf ogt, %109, %110 : vector<16x16xf32>
    %cst_52 = arith.constant 2.000000e-01 : f32
    %112 = vector.broadcast %cst_52 : f32 to vector<16x16xf32>
    %113 = arith.mulf %112, %109 : vector<16x16xf32>
    %114 = arith.select %111, %109, %113 : vector<16x16xi1>, vector<16x16xf32>
    %cst_53 = arith.constant -1.000000e+30 : f32
    %115 = vector.broadcast %cst_53 : f32 to vector<16x16xf32>
    %116 = arith.select %28, %114, %115 : vector<16x16xi1>, vector<16x16xf32>
    %cst_54 = arith.constant dense<0xFF800000> : vector<16xf32>
    %117 = vector.multi_reduction <maximumf>, %116, %cst_54 [1] : vector<16x16xf32> to vector<16xf32>
    %118 = vector.shape_cast %117 : vector<16xf32> to vector<16x1xf32>
    %119 = vector.broadcast %118 : vector<16x1xf32> to vector<16x16xf32>
    %120 = arith.subf %116, %119 : vector<16x16xf32>
    %121 = math.exp %120 : vector<16x16xf32>
    %cst_55 = arith.constant 0.000000e+00 : f32
    %122 = vector.broadcast %cst_55 : f32 to vector<16x16xf32>
    %123 = arith.select %28, %121, %122 : vector<16x16xi1>, vector<16x16xf32>
    %cst_56 = arith.constant dense<0.000000e+00> : vector<16xf32>
    %124 = vector.multi_reduction <add>, %123, %cst_56 [1] : vector<16x16xf32> to vector<16xf32>
    %125 = vector.shape_cast %124 : vector<16xf32> to vector<16x1xf32>
    %cst_57 = arith.constant 2.000000e+00 : f32
    %126 = vector.broadcast %cst_57 : f32 to vector<16x1xf32>
    %127 = arith.mulf %125, %126 : vector<16x1xf32>
    %128 = tpu.reciprocal %127 : vector<16x1xf32> -> vector<16x1xf32>
    %129 = vector.broadcast %128 : vector<16x1xf32> to vector<16x16xf32>
    %130 = arith.mulf %123, %129 : vector<16x16xf32>
    %cst_58 = arith.constant dense<0.000000e+00> : vector<16x8xf32>
    %131 = tpu.matmul %130, %104, %cst_58 {dimension_numbers = #tpu.dot_dimension_numbers<[1], [0], [0], [1], [0, 0, 1, 1], [], []>} : vector<16x16xf32>, vector<16x8xf32>, vector<16x8xf32> -> vector<16x8xf32>
    %132 = arith.addf %103, %131 : vector<16x8xf32>
    %133 = vector.extract_strided_slice %98 {offsets = [0, 8], sizes = [16, 8], strides = [1, 1]} : vector<16x16xf32> to vector<16x8xf32>
    %134 = vector.extract_strided_slice %102 {offsets = [0, 1], sizes = [16, 1], strides = [1, 1]} : vector<16x2xf32> to vector<16x1xf32>
    %135 = vector.extract_strided_slice %100 {offsets = [1, 0], sizes = [1, 16], strides = [1, 1]} : vector<2x16xf32> to vector<1x16xf32>
    %136 = vector.broadcast %134 : vector<16x1xf32> to vector<16x16xf32>
    %137 = vector.broadcast %135 : vector<1x16xf32> to vector<16x16xf32>
    %138 = arith.addf %136, %137 : vector<16x16xf32>
    %cst_59 = arith.constant 0.000000e+00 : f32
    %139 = vector.broadcast %cst_59 : f32 to vector<16x16xf32>
    %140 = arith.cmpf ogt, %138, %139 : vector<16x16xf32>
    %cst_60 = arith.constant 2.000000e-01 : f32
    %141 = vector.broadcast %cst_60 : f32 to vector<16x16xf32>
    %142 = arith.mulf %141, %138 : vector<16x16xf32>
    %143 = arith.select %140, %138, %142 : vector<16x16xi1>, vector<16x16xf32>
    %cst_61 = arith.constant -1.000000e+30 : f32
    %144 = vector.broadcast %cst_61 : f32 to vector<16x16xf32>
    %145 = arith.select %28, %143, %144 : vector<16x16xi1>, vector<16x16xf32>
    %cst_62 = arith.constant dense<0xFF800000> : vector<16xf32>
    %146 = vector.multi_reduction <maximumf>, %145, %cst_62 [1] : vector<16x16xf32> to vector<16xf32>
    %147 = vector.shape_cast %146 : vector<16xf32> to vector<16x1xf32>
    %148 = vector.broadcast %147 : vector<16x1xf32> to vector<16x16xf32>
    %149 = arith.subf %145, %148 : vector<16x16xf32>
    %150 = math.exp %149 : vector<16x16xf32>
    %cst_63 = arith.constant 0.000000e+00 : f32
    %151 = vector.broadcast %cst_63 : f32 to vector<16x16xf32>
    %152 = arith.select %28, %150, %151 : vector<16x16xi1>, vector<16x16xf32>
    %cst_64 = arith.constant dense<0.000000e+00> : vector<16xf32>
    %153 = vector.multi_reduction <add>, %152, %cst_64 [1] : vector<16x16xf32> to vector<16xf32>
    %154 = vector.shape_cast %153 : vector<16xf32> to vector<16x1xf32>
    %cst_65 = arith.constant 2.000000e+00 : f32
    %155 = vector.broadcast %cst_65 : f32 to vector<16x1xf32>
    %156 = arith.mulf %154, %155 : vector<16x1xf32>
    %157 = tpu.reciprocal %156 : vector<16x1xf32> -> vector<16x1xf32>
    %158 = vector.broadcast %157 : vector<16x1xf32> to vector<16x16xf32>
    %159 = arith.mulf %152, %158 : vector<16x16xf32>
    %cst_66 = arith.constant dense<0.000000e+00> : vector<16x8xf32>
    %160 = tpu.matmul %159, %133, %cst_66 {dimension_numbers = #tpu.dot_dimension_numbers<[1], [0], [0], [1], [0, 0, 1, 1], [], []>} : vector<16x16xf32>, vector<16x8xf32>, vector<16x8xf32> -> vector<16x8xf32>
    %161 = arith.addf %132, %160 : vector<16x8xf32>
    %c304 = arith.constant 304 : index
    %c0_67 = arith.constant 0 : index
    %162 = vector.load %arg0[%c304, %c0_67] : memref<312x128xf32, #tpu.memory_space<vmem>>, vector<1x8xf32>
    %163 = vector.broadcast %162 : vector<1x8xf32> to vector<16x8xf32>
    %164 = arith.addf %161, %163 : vector<16x8xf32>
    %c0_68 = arith.constant 0 : index
    %c0_69 = arith.constant 0 : index
    %165 = vector.load %arg2[%c0_68, %c0_69] : memref<16x8xf32, #tpu.memory_space<vmem>>, vector<16x8xf32>
    tpu.vector_store %arg2[%c0_68, %c0_69], %164 {strides = array<i32>} : memref<16x8xf32, #tpu.memory_space<vmem>>, vector<16x8xf32>,
    return
  }
}

</mosaic_0001>

<bundles_post_ra>
// kernel: graph_node_embedder_forward.1
= control target key start
LH: loop header
LB: loop body
LE: loop exit
PB: predicated region body
PF: predicated region fallthrough
CT: control target
= control target key end

     0   :  { %vm34_vm0 = vcmask 1043456   ;;  %vm21_vm1 = vcmask 31744   ;;  %vm136_vm2 = vcmask 261120   ;;  %vm348_vm3 = vcmask 64512   ;;  %s1988_s29 = smov 120   ;;  %s2319_s0 = inlined_call_operand.vmem [shape: f32[312,128], index: 0, kind: input, shape index: {}]   ;;  %s2320_s1 = inlined_call_operand.vmem [shape: f32[112,128], index: 1, kind: input, shape index: {}]   ;;  %s2321_s2 = inlined_call_operand.vmem [shape: f32[16,8], index: 2, kind: output, shape index: {}]  }
   0x1   :  { %v15_v0 = vld [vmem:[%s2319_s0] sm:$0xf]  ;;  %v12_v2 = vld [vmem:[%s2320_s1 + $0x8] sm:$0xff]  ;;  %v13_v3 = vld [vmem:[%s2320_s1 + $0x10] sm:$0xff]  ;;  %vm524_vm4 = vcmask 130048   ;;  %vm1983_vm5 = vmmov 0  }
   0x2   :  { %v11_v1 = vld [vmem:[%s2320_s1] sm:$0xff]  ;;  %1679 = vmatprep.subr.msk.mxu1 %vm34_vm0, %v15_v0  ;;  %v127_v4 = vld [vmem:[%s2319_s0 + $0x10] sm:$0xff]  ;;  %v128_v5 = vld [vmem:[%s2319_s0 + $0x18] sm:$0xff] }
   0x3   :  { %1681 = vmatprep.mubr.msk.f32.mxu1 %vm21_vm1, %v11_v1  ;;  %1680 = vmatpush3.msk.msra.mxu1 %vm34_vm0, %v15_v0  ;;  %v1829_v6 = vpack.c.bf16 %v128_v5, %v127_v4  ;;  %v14_v7 = vld [vmem:[%s2320_s1 + $0x18] sm:$0xff]  ;;  %v129_v8 = vld [vmem:[%s2319_s0 + $0x20] sm:$0xff]  ;;  %v130_v9 = vld [vmem:[%s2319_s0 + $0x28] sm:$0xff] }
   0x4   :  { %1682 = vmatmul.mubr.msk.f32.vlgmr.msra.gmra.mrb[0].mxu1 %vm21_vm1, %v12_v2  ;;  %v1833_v10 = vpack.c.bf16 %v130_v9, %v129_v8  ;;  %v242_v11 = vld [vmem:[%s2319_s0 + $0x48] sm:$0xff]  ;;  %v243_v12 = vld [vmem:[%s2319_s0 + $0x50] sm:$0xff]  ;;  %v244_v13 = vld [vmem:[%s2319_s0 + $0x58] sm:$0xff] }
   0x5   :  { %1684 = vmatprep.mubr.msk.f32.mxu1 %vm21_vm1, %v13_v3  ;;  %1830 = vmatprep.subr.bf16.mxu1 %v1829_v6  ;;  %v1837_v14 = vpack.c.bf16 %v243_v12, %v242_v11  ;;  %v245_v15 = vld [vmem:[%s2319_s0 + $0x60] sm:$0xff]  ;;  %v246_v17 = vld [vmem:[%s2319_s0 + $0x68] sm:$0xff]  ;;  %v247_v18 = vld [vmem:[%s2319_s0 + $0x70] sm:$0xff] }
   0x6   :  { %1832 = vmatpush3.bf16.msra.mxu1 %v1829_v6  ;;  %v1841_v16 = vpack.c.bf16 %v245_v15, %v244_v13  ;;  %v1845_v19 = vpack.c.bf16 %v247_v18, %v246_v17  ;;  %v248_v20 = vld [vmem:[%s2319_s0 + $0x78] sm:$0xff]  ;;  %v249_v21 = vld [vmem:[%s2319_s0 + $0x80] sm:$0xff]  ;;  %v250_v23 = vld [vmem:[%s2319_s0 + $0x88] sm:$0xff] }
   0x7   :  { %1834 = vmatprep.subr.bf16.mxu1 %v1833_v10  ;;  %1838 = vmatprep.subr.bf16.mxu0 %v1837_v14  ;;  %v1849_v22 = vpack.c.bf16 %v249_v21, %v248_v20  ;;  %v251_v24 = vld [vmem:[%s2319_s0 + $0x90] sm:$0xff]  ;;  %v252_v26 = vld [vmem:[%s2319_s0 + $0x98] sm:$0xff]  ;;  %v253_v27 = vld [vmem:[%s2319_s0 + $0xa0] sm:$0xff] }
   0x8   :  { %1685 = vmatmul.mubr.msk.f32.gmra.mrb[2].mxu1 %vm21_vm1, %v14_v7  ;;  %1840 = vmatpush3.bf16.msra.mxu0 %v1837_v14  ;;  %v1853_v25 = vpack.c.bf16 %v251_v24, %v250_v23  ;;  %v1857_v28 = vpack.c.bf16 %v253_v27, %v252_v26  ;;  %v254_v29 = vld [vmem:[%s2319_s0 + $0xa8] sm:$0xff]  ;;  %v255_v30 = vld [vmem:[%s2319_s0 + $0xb0] sm:$0xff]  ;;  %v256_v45 = vld [vmem:[%s2319_s0 + $0xb8] sm:$0xff]  ;;  %v1982_v26 = vmov 0.0|0.0   ;;  %v1984_v27 = vmov 0.0  }
   0x9   :  { %1842 = vmatprep.subr.bf16.mxu0 %v1841_v16  ;;  %v1861_v31 = vpack.c.bf16 %v255_v30, %v254_v29  ;;  %v1557_v32 = vld [vmem:[%s2319_s0 + $0x8] ss:$0 sm:$0xff]  ;;  %v257_v46 = vld [vmem:[%s2319_s0 + $0xc0] sm:$0xff]  ;;  %v347_v48 = vld [vmem:[%s2319_s0 + $0x38] sm:$0xff] }
   0xa   :  { %1836 = vmatpush3.bf16.msra.mxu1 %v1833_v10  ;;  %v1865_v47 = vpack.c.bf16 %v257_v46, %v256_v45  ;;  %v1563_v49 = vld [vmem:[%s2319_s0 + $0x30] ss:$0 sm:$0xff]  ;;  %v234_v53 = vld [vmem:[%s2320_s1 + $0x20] sm:$0xff]  ;;  %v235_v54 = vld [vmem:[%s2320_s1 + $0x28] sm:$0xff] }
   0xb   :  { %1739 = vmatprep.subr.mxu1 %v347_v48  ;;  %v236_v61 = vld [vmem:[%s2320_s1 + $0x30] sm:$0xff]  ;;  %v237_v62 = vld [vmem:[%s2320_s1 + $0x38] sm:$0xff]  ;;  %v343_v4 = vld [vmem:[%s2320_s1 + $0x40] sm:$0xff] }
   0xc   :  { %1844 = vmatpush3.bf16.msra.mxu0 %v1841_v16  ;;  %v345_v2 = vld [vmem:[%s2320_s1 + $0x50] sm:$0xff]  ;;  %v346_v3 = vld [vmem:[%s2320_s1 + $0x58] sm:$0xff]  ;;  %v344_v11 = vld [vmem:[%s2320_s1 + $0x48] sm:$0xff] }
   0xd   :  { %1846 = vmatprep.subr.bf16.mxu0 %v1845_v19  ;;  %v522_v12 = vld [vmem:[%s2319_s0 + $0xc8] sm:$0xff]  ;;  %v523_v13 = vld [vmem:[%s2319_s0 + $0xd0] sm:$0xff]  ;;  %v686_v15 = vld [vmem:[%s2319_s0 + $0xe0] sm:$0xff] }
   0xe   :  { %v1877_v14 = vpack.c.bf16 %v523_v13, %v522_v12  ;;  %v687_v16 = vld [vmem:[%s2319_s0 + $0xe8] sm:$0xff]  ;;  %v688_v17 = vld [vmem:[%s2319_s0 + $0xf0] sm:$0xff]  ;;  %v1572_v21 = vld [vmem:[%s2319_s0 + $0x40] ss:$0 sm:$0xff] }
   0xf   :  { %v1885_v18 = vpack.c.bf16 %v687_v16, %v686_v15  ;;  %vm1883_vm6 = vmpackc.low %vm136_vm2, %vm136_vm2  ;;  %v2185_v45 = vld [vmem:[%s2320_s1 + $0x60] sm:$0xff] }
  0x10   :  { %1848 = vmatpush3.bf16.msra.mxu0 %v1845_v19  ;;  %v689_v19 = vld [vmem:[%s2319_s0 + $0xf8] sm:$0xff]  ;;  %vm520_vm7 = vcmp.gt.f32.partialorder %v2185_v45, 0.0  ;;  %vm1907_vm13 = vmpackc.low %vm524_vm4, %vm524_vm4 }
  0x11   :  { %1850 = vmatprep.subr.bf16.mxu0 %v1849_v22  ;;  %v1889_v20 = vpack.c.bf16 %v689_v19, %v688_v17 }
  0x14   :  { %1852 = vmatpush3.bf16.msra.mxu0 %v1849_v22 }
  0x15   :  { %1854 = vmatprep.subr.bf16.mxu0 %v1853_v25 }
  0x18   :  { %1856 = vmatpush3.bf16.msra.mxu0 %v1853_v25 }
  0x19   :  { %1858 = vmatprep.subr.bf16.mxu0 %v1857_v28 }
  0x1c   :  { %1860 = vmatpush3.bf16.msra.mxu0 %v1857_v28 }
  0x1d   :  { %1862 = vmatprep.subr.bf16.mxu0 %v1861_v31 }
  0x20   :  { %1864 = vmatpush3.bf16.msra.mxu0 %v1861_v31 }
  0x21   :  { %1866 = vmatprep.subr.bf16.mxu0 %v1865_v47 }
  0x24   :  { %1868 = vmatpush3.bf16.msra.mxu0 %v1865_v47 }
  0x25   :  { %1886 = vmatprep.subr.bf16.mxu0 %v1885_v18 }
  0xd7   :  { %v1683_v33 = vpop.f32.mrb[0].mxu1 }
  0xd8   :  { %v110_v34 = vadd.f32 %v1683_v33, %v1557_v32  ;;  %v104_v35 = vpop.f32.mrb[1].mxu1  ;;  %v1985_v33 = vmov 1  }
  0xd9   :  { %v105_v36 = vadd.f32 %v1557_v32, %v104_v35  ;;  %1934 = vset.pattern.permute.xlu0 %v1985_v33 }
  0xda   :  { %v124_v39 = vmax.f32 %v110_v34, 0.0  ;;  %v1986_v34 = vmov 0  }
  0xdb   :  { %v123_v37 = vmax.f32 %v105_v36, 0.0  ;;  %v1686_v38 = vpop.f32.mrb[2].mxu1  ;;  %1935 = vset.pattern.permute.xlu1 %v1986_v34 }
  0xdc   :  { %v120_v40 = vadd.f32 %v1686_v38, %v1557_v32  ;;  %v114_v41 = vpop.f32.mrb[3].mxu1 }
  0xdd   :  { %v115_v42 = vadd.f32 %v1557_v32, %v114_v41  ;;  %1695 = vmatprep.mubr.msk.f32.mxu1 %vm136_vm2, %v123_v37  ;;  %v606_v32 = vld [vmem:[%s2319_s0 + $0xd8] sm:$0x3] }
  0xde   :  { %1696 = vmatmul.mubr.msk.f32.vlgmr.msra.gmra.mrb[4].mxu1 %vm136_vm2, %v124_v39  ;;  %v126_v44 = vmax.f32 %v120_v40, 0.0  ;;  %v775_v39 = vlaneseq }
  0xdf   :  { %v125_v43 = vmax.f32 %v115_v42, 0.0  ;;  %1740 = vmatpush3.msra.mxu1 %v347_v48 }
  0xe0   :  { %v2174_v40 = vshrl.u32 %v775_v39, 7 }
  0xe1   :  { %1698 = vmatprep.mubr.msk.f32.mxu1 %vm136_vm2, %v125_v43 }
  0xe2   :  { %1699 = vmatmul.mubr.msk.f32.gmra.mrb[6].mxu1 %vm136_vm2, %v126_v44  ;;  %v777_v41 = vsub.s32 0, %v2174_v40  ;;  %v825_v42 = vsub.s32 1, %v2174_v40 }
  0xe3   :  { %1741 = vmatprep.mubr.msk.f32.mxu1 %vm348_vm3, %v345_v2 }
  0xe6   :  { %1742 = vmatmul.mubr.msk.f32.vlgmr.msra.gmra.mrb[8].mxu1 %vm348_vm3, %v346_v3 }
  0xe7   :  { %1752 = vmatprep.mubr.msk.f32.mxu1 %vm136_vm2, %v343_v4 }
 0x1b1   :  { %v1697_v50 = vpop.f32.mrb[4].mxu1 }
 0x1b2   :  { %v221_v51 = vadd.f32 %v1697_v50, %v1563_v49  ;;  %v215_v52 = vpop.f32.mrb[5].mxu1  ;;  %v2191_v50 = vld [vmem:[%s2320_s1 + $0x68] sm:$0xff]  ;;  %s1987_s1 = smov 112  }
 0x1b3   :  { %v216_v55 = vadd.f32 %v1563_v49, %v215_v52  ;;  %vm521_vm10 = vcmp.gt.f32.partialorder %v2191_v50, 0.0 }
 0x1b4   :  { %v239_v58 = vmul.f32 %v235_v54, %v221_v51 }
 0x1b5   :  { %v1700_v56 = vpop.f32.mrb[6].mxu1  ;;  %v238_v57 = vmul.f32 %v234_v53, %v216_v55 }
 0x1b6   :  { %v231_v59 = vadd.f32 %v1700_v56, %v1563_v49  ;;  %v225_v60 = vpop.f32.mrb[7].mxu1 }
 0x1b7   :  { %v226_v63 = vadd.f32 %v1563_v49, %v225_v60  ;;  %1733 = vmatprep.mubr.f32.mxu0 %v238_v57 }
 0x1b8   :  { %1734 = vmatmul.mubr.f32.vlgmr.msra.gmra.mrb[0].mxu0 %v239_v58  ;;  %v241_v1 = vmul.f32 %v237_v62, %v231_v59 }
 0x1b9   :  { %v240_v0 = vmul.f32 %v236_v61, %v226_v63  ;;  %1888 = vmatpush3.bf16.msra.mxu0 %v1885_v18 }
 0x1ba   :  { %1890 = vmatprep.subr.bf16.mxu0 %v1889_v20 }
 0x1bb   :  { %1736 = vmatprep.mubr.f32.mxu0 %v240_v0 }
 0x1bc   :  { %1737 = vmatmul.mubr.f32.gmra.mrb[2].mxu0 %v241_v1 }
 0x1bd   :  { %1892 = vmatpush3.bf16.msra.mxu0 %v1889_v20 }
 0x28b   :  { %v1735_v5 = vpop.f32.mrb[0].mxu0 }
 0x28c   :  { %v324_v6 = vpop.f32.mrb[1].mxu0 }
 0x28d   :  { %v1869_v7 = vpack.c.bf16 %v1735_v5, %v324_v6 }
 0x28f   :  { %v1738_v8 = vpop.f32.mrb[2].mxu0  ;;  %1870 = vmatprep.subr.bf16.mxu1 %v1869_v7 }
 0x290   :  { %v334_v9 = vpop.f32.mrb[3].mxu0  ;;  %1872 = vmatpush3.bf16.msra.mxu1 %v1869_v7 }
 0x291   :  { %v1873_v10 = vpack.c.bf16 %v1738_v8, %v334_v9 }
 0x293   :  { %1874 = vmatprep.subr.bf16.mxu1 %v1873_v10 }
 0x294   :  { %1876 = vmatpush3.bf16.msra.mxu1 %v1873_v10 }
 0x295   :  { %1878 = vmatprep.subr.bf16.mxu1 %v1877_v14 }
 0x297   :  { %1753 = vmatmul.mubr.msk.f32.vlgmr.msra.gmra.mrb[8].mxu1 %vm136_vm2, %v344_v11 }
 0x298   :  { %1880 = vmatpush3.bf16.msra.mxu1 %v1877_v14 }
 0x299   :  { %1881 = vmatprep.subr.bf16.mxu1 %v1982_v26 }
 0x36a   :  { %v1754_v22 = vpop.f32.mrb[8].mxu1 }
 0x36b   :  { %v502_v23 = vpop.f32.mrb[9].mxu1  ;;  %v517_v25 = vadd.f32 %v1754_v22, %v1572_v21 }
 0x36c   :  { %v516_v24 = vadd.f32 %v1572_v21, %v502_v23 }
 0x36e   :  { %1759 = vmatprep.mubr.msk.f32.mxu1 %vm524_vm4, %v516_v24 }
 0x36f   :  { %1760 = vmatmul.mubr.msk.f32.vlgmr.msra.gmra.mrb[10].mxu1 %vm524_vm4, %v517_v25 }
 0x370   :  { %1766 = vmatprep.mubr.msk.f32.mxu1 %vm1983_vm5, %v1984_v27 }
 0x442   :  { %v2150_v28 = vpop.f32.mrb[10].mxu1 }
 0x443   :  { %v2152_v29 = vpop.f32.mrb[11].mxu1 }
 0x444   :  { %v1936_v30 = vpack.i.bf16 %v2150_v28, %v2152_v29  ;;  %v2160_v31 = vpack.c.bf16 %v2150_v28, %v2152_v29  ;;  %1777 = vmatprep.mubr.msk.f32.mxu0 %vm136_vm2, %v2152_v29 }
 0x445   :  { %1778 = vmatmul.mubr.msk.f32.vlgmr.msra.gmra.mrb[4].mxu0 %vm136_vm2, %v2150_v28 }
 0x446   :  { %1884 = vmatpush3.bf16.xpose.msk.msra.mxu1 %vm1883_vm6, %v2160_v31 }
 0x44d   :  { %1767 = vmatmul.mubr.msk.f32.vlgmr.msra.gmra.mrb[12].mxu1 %vm136_vm2, %v606_v32 }
 0x518   :  { %v1779_v35 = vpop.f32.mrb[4].mxu0 }
 0x519   :  { %v756_v36 = vpop.f32.mrb[5].mxu0 }
 0x51a   :  { %767 = vperm.xlu1 %1935, %v756_v36   ;;  %816 = vperm.xlu0 %1934, %v756_v36  }
 0x51e   :  { %772 = vperm.xlu1 %1935, %v1779_v35   ;;  %820 = vperm.xlu0 %1934, %v1779_v35  }
 0x520   :  { %v682_v37 = vpop.f32.mrb[12].mxu1 }
 0x521   :  { %v1768_v38 = vpop.f32.mrb[13].mxu1  ;;  %v778_v43 = vrot.slane %v682_v37, %v777_v41  ;;  %v826_v44 = vrot.slane %v682_v37, %v825_v42 }
 0x522   :  { %1941 = vset.pattern.permute.xlu1 %v1985_v33 }
 0x599   :  { %v768_v46 = vpop.permute.xlu1 %767  ;;  %v817_v47 = vpop.permute.xlu0 %816 }
 0x59a   :  { %v779_v48 = vadd.f32 %v778_v43, %v768_v46  ;;  %v827_v49 = vadd.f32 %v826_v44, %v817_v47 }
 0x59c   :  { %v783_v51 = vmul.f32 0.2, %v779_v48  ;;  %v831_v52 = vmul.f32 0.2, %v827_v49  ;;  %vm829_vm8 = vcmp.gt.f32.partialorder %v827_v49, 0.0  ;;  %vm781_vm9 = vcmp.gt.f32.partialorder %v779_v48, 0.0 }
 0x59d   :  { %v773_v53 = vpop.permute.xlu1 %772  ;;  %v821_v54 = vpop.permute.xlu0 %820 }
 0x59e   :  { %v780_v55 = vadd.f32 %v778_v43, %v773_v53  ;;  %v828_v56 = vadd.f32 %v826_v44, %v821_v54  ;;  %v833_v57 = vsel %vm829_vm8, %v827_v49, %v831_v52  ;;  %v785_v58 = vsel %vm781_vm9, %v779_v48, %v783_v51 }
 0x59f   :  { %v835_v59 = vsel %vm520_vm7, %v833_v57, -1e+30  ;;  %v787_v63 = vsel %vm520_vm7, %v785_v58, -1e+30 }
 0x5a0   :  { %v784_v60 = vmul.f32 0.2, %v780_v55  ;;  %v832_v61 = vmul.f32 0.2, %v828_v56  ;;  %v837_v62 = vsel %vm524_vm4, %v835_v59, -inf  ;;  %vm830_vm11 = vcmp.gt.f32.partialorder %v828_v56, 0.0 }
 0x5a1   :  { %838 = vmax.xlane.f32.xlu0 %v837_v62  ;;  %vm782_vm12 = vcmp.gt.f32.partialorder %v780_v55, 0.0  ;;  %v789_v4 = vsel %vm524_vm4, %v787_v63, -inf  ;;  %v1039_v62 = vld [vmem:[%s2319_s0 + $0x110] sm:$0xff] }
 0x5a2   :  { %v834_v0 = vsel %vm830_vm11, %v828_v56, %v832_v61  ;;  %v786_v1 = vsel %vm782_vm12, %v780_v55, %v784_v60  ;;  %v1038_v61 = vld [vmem:[%s2319_s0 + $0x108] sm:$0xff] }
 0x5a3   :  { %v836_v2 = vsel %vm521_vm10, %v834_v0, -1e+30  ;;  %v788_v5 = vsel %vm521_vm10, %v786_v1, -1e+30  ;;  %v1584_v0 = vld [vmem:[%s2319_s0 + $0x100] ss:$0 sm:$0xff] }
 0x5a4   :  { %v840_v3 = vsel %vm524_vm4, %v836_v2, -inf  ;;  %v792_v6 = vsel %vm524_vm4, %v788_v5, -inf }
 0x5a5   :  { %841 = vmax.xlane.f32.xlu1 %v840_v3  ;;  %790 = vmax.xlane.f32.xlu0 %v789_v4 }
 0x5a9   :  { %793 = vmax.xlane.f32.xlu0 %v792_v6 }
 0x62e   :  { %v839_v7 = vpop.xlane.xlu0 %838 }
 0x62f   :  { %v843_v8 = vsub.f32 %v835_v59, %v839_v7 }
 0x631   :  { %v845_v9 = vmul.f32 1.442695, %v843_v8 }
 0x632   :  { %v842_v10 = vpop.xlane.xlu1 %841  ;;  %v791_v11 = vpop.xlane.xlu0 %790 }
 0x633   :  { %1950 = vpow2.f32 %v845_v9  ;;  %v844_v12 = vsub.f32 %v836_v2, %v842_v10  ;;  %v795_v13 = vsub.f32 %v787_v63, %v791_v11  ;;  %v1202_v63 = vld [vmem:[%s2319_s0 + $0x128] sm:$0xff]  ;;  %v1121_v9 = vld [vmem:[%s2319_s0 + $0x118] sm:$0x3] }
 0x635   :  { %v847_v14 = vmul.f32 1.442695, %v844_v12  ;;  %v797_v15 = vmul.f32 1.442695, %v795_v13 }
 0x636   :  { %v794_v16 = vpop.xlane.xlu0 %793 }
 0x637   :  { %1952 = vpow2.f32 %v847_v14  ;;  %v796_v17 = vsub.f32 %v788_v5, %v794_v16 }
 0x638   :  { %1954 = vpow2.f32 %v797_v15 }
 0x639   :  { %v799_v18 = vmul.f32 1.442695, %v796_v17 }
 0x63b   :  { %1956 = vpow2.f32 %v799_v18 }
 0x63d   :  { %v1951_v19 = vpop.eup %1950 }
 0x63e   :  { %v849_v20 = vsel %vm520_vm7, %v1951_v19, 0.0 }
 0x63f   :  { %v851_v21 = vsel %vm524_vm4, %v849_v20, 0.0 }
 0x640   :  { %852 = vadd.xlane.f32.xlu1 %v851_v21 }
 0x641   :  { %v1953_v22 = vpop.eup %1952 }
 0x642   :  { %v1955_v23 = vpop.eup %1954  ;;  %v850_v24 = vsel %vm521_vm10, %v1953_v22, 0.0 }
 0x643   :  { %v854_v25 = vsel %vm524_vm4, %v850_v24, 0.0  ;;  %v801_v32 = vsel %vm520_vm7, %v1955_v23, 0.0 }
 0x644   :  { %855 = vadd.xlane.f32.xlu0 %v854_v25  ;;  %v803_v35 = vsel %vm524_vm4, %v801_v32, 0.0 }
 0x645   :  { %v1957_v36 = vpop.eup %1956  ;;  %804 = vadd.xlane.f32.xlu1 %v803_v35 }
 0x646   :  { %v802_v37 = vsel %vm521_vm10, %v1957_v36, 0.0 }
 0x647   :  { %v806_v38 = vsel %vm524_vm4, %v802_v37, 0.0 }
 0x648   :  { %807 = vadd.xlane.f32.xlu0 %v806_v38 }
 0x656   :  { %1937 = vrot.lane.b32.xlu1 %v1936_v30, %s1987_s1 }
 0x6cd   :  { %v853_v39 = vpop.xlane.xlu1 %852 }
 0x6ce   :  { %v857_v43 = vmul.f32 2.0, %v853_v39 }
 0x6d0   :  { %1958 = vrcp.f32 %v857_v43 }
 0x6d1   :  { %v856_v44 = vpop.xlane.xlu0 %855 }
 0x6d2   :  { %v805_v46 = vpop.xlane.xlu1 %804  ;;  %v858_v47 = vmul.f32 2.0, %v856_v44 }
 0x6d3   :  { %v809_v48 = vmul.f32 2.0, %v805_v46 }
 0x6d4   :  { %1960 = vrcp.f32 %v858_v47 }
 0x6d5   :  { %1962 = vrcp.f32 %v809_v48  ;;  %v808_v49 = vpop.xlane.xlu0 %807 }
 0x6d6   :  { %v1938_v51 = vpop.permute.xlu1 %1937  ;;  %v810_v52 = vmul.f32 2.0, %v808_v49 }
 0x6d7   :  { %v1940_v53 = vunpack.i.h.bf16 %v1938_v51  ;;  %v1939_v54 = vunpack.i.l.bf16 %v1938_v51 }
 0x6d8   :  { %1964 = vrcp.f32 %v810_v52 }
 0x6d9   :  { %v1893_v55 = vpack.c.bf16 %v1940_v53, %v1939_v54 }
 0x6da   :  { %v1959_v56 = vpop.eup %1958 }
 0x6db   :  { %1894 = vmatprep.subr.bf16.mxu1 %v1893_v55  ;;  %v861_v28 = vmul.f32 %v1959_v56, %v849_v20 }
 0x6dc   :  { %1896 = vmatpush3.bf16.msra.mxu1 %v1893_v55 }
 0x6dd   :  { %1898 = vmatprep.subr.bf16.mxu1 %v2160_v31  ;;  %1784 = vmatprep.mubr.msk.f32.mxu1 %vm524_vm4, %v861_v28 }
 0x6de   :  { %v1961_v29 = vpop.eup %1960 }
 0x6df   :  { %v1963_v30 = vpop.eup %1962  ;;  %v862_v57 = vmul.f32 %v1961_v29, %v850_v24 }
 0x6e0   :  { %v813_v58 = vmul.f32 %v1963_v30, %v801_v32 }
 0x6e1   :  { %1785 = vmatmul.mubr.msk.f32.vlgmr.msra.gmra.mrb[14].mxu1 %vm524_vm4, %v862_v57 }
 0x6e2   :  { %1900 = vmatpush3.bf16.msra.mxu1 %v2160_v31  ;;  %1791 = vmatprep.mubr.msk.f32.mxu1 %vm524_vm4, %v813_v58  ;;  %v1965_v59 = vpop.eup %1964  ;;  %v1901_v31 = vpack.c.bf16 %v1039_v62, %v1038_v61 }
 0x6e3   :  { %1905 = vmatprep.subr.bf16.mxu1 %v1982_v26  ;;  %v814_v60 = vmul.f32 %v1965_v59, %v802_v37  ;;  %v1201_v26 = vld [vmem:[%s2319_s0 + $0x120] sm:$0xff] }
 0x6e4   :  { %1902 = vmatprep.subr.bf16.mxu0 %v1901_v31 }
 0x6e5   :  { %1904 = vmatpush3.bf16.msra.mxu0 %v1901_v31 }
 0x6e9   :  { %1792 = vmatmul.mubr.msk.f32.vlgmr.msra.gmra.mrb[14].mxu1 %vm524_vm4, %v814_v60 }
 0x6ea   :  { %1805 = vmatprep.mubr.msk.f32.mxu1 %vm1983_vm5, %v1984_v27  ;;  %v1909_v27 = vpack.c.bf16 %v1202_v63, %v1201_v26 }
 0x6ec   :  { %1910 = vmatprep.subr.bf16.mxu0 %v1909_v27 }
 0x7bc   :  { %v1793_v1 = vpop.f32.mrb[14].mxu1 }
 0x7bd   :  { %v1022_v2 = vpop.f32.mrb[15].mxu1  ;;  %v1037_v4 = vadd.f32 %v1793_v1, %v1584_v0 }
 0x7be   :  { %v1036_v3 = vadd.f32 %v1584_v0, %v1022_v2 }
 0x7c0   :  { %1798 = vmatprep.mubr.msk.f32.mxu0 %vm524_vm4, %v1036_v3 }
 0x7c1   :  { %1799 = vmatmul.mubr.msk.f32.vlgmr.msra.gmra.mrb[6].mxu0 %vm524_vm4, %v1037_v4 }
 0x7c2   :  { %1912 = vmatpush3.bf16.msra.mxu0 %v1909_v27 }
 0x894   :  { %v2247_v5 = vpop.f32.mrb[6].mxu0 }
 0x895   :  { %v2249_v6 = vpop.f32.mrb[7].mxu0 }
 0x896   :  { %v1944_v7 = vpack.i.bf16 %v2247_v5, %v2249_v6  ;;  %v2257_v8 = vpack.c.bf16 %v2247_v5, %v2249_v6  ;;  %1812 = vmatprep.mubr.msk.f32.mxu0 %vm524_vm4, %v2249_v6 }
 0x897   :  { %1813 = vmatmul.mubr.msk.f32.vlgmr.msra.gmra.mrb[8].mxu0 %vm524_vm4, %v2247_v5 }
 0x898   :  { %1908 = vmatpush3.bf16.xpose.msk.msra.mxu1 %vm1907_vm13, %v2257_v8 }
 0x89f   :  { %1806 = vmatmul.mubr.msk.f32.vlgmr.msra.gmra.mrb[16].mxu1 %vm524_vm4, %v1121_v9 }
 0x96a   :  { %v1814_v10 = vpop.f32.mrb[8].mxu0 }
 0x96b   :  { %1333 = vperm.xlu1 %1941, %v1814_v10   ;;  %v1269_v11 = vpop.f32.mrb[9].mxu0 }
 0x96c   :  { %1329 = vperm.xlu0 %1934, %v1269_v11  }
 0x96f   :  { %1942 = vset.pattern.permute.xlu1 %v1986_v34 }
 0x970   :  { %1280 = vperm.xlu1 %1942, %v1269_v11   ;;  %1943 = vset.pattern.permute.xlu0 %v1986_v34 }
 0x971   :  { %1285 = vperm.xlu0 %1943, %v1814_v10  }
 0x972   :  { %v1197_v12 = vpop.f32.mrb[16].mxu1 }
 0x973   :  { %v1807_v13 = vpop.f32.mrb[17].mxu1  ;;  %v1339_v14 = vrot.slane %v1197_v12, %v825_v42  ;;  %v1291_v20 = vrot.slane %v1197_v12, %v777_v41 }
 0x975   :  { %1949 = vset.pattern.permute.xlu0 %v1985_v33 }
 0x9ea   :  { %v1334_v15 = vpop.permute.xlu1 %1333 }
 0x9eb   :  { %v1341_v16 = vadd.f32 %v1339_v14, %v1334_v15  ;;  %v1330_v17 = vpop.permute.xlu0 %1329 }
 0x9ec   :  { %v1340_v18 = vadd.f32 %v1339_v14, %v1330_v17 }
 0x9ed   :  { %v1345_v19 = vmul.f32 0.2, %v1341_v16  ;;  %vm1343_vm14 = vcmp.gt.f32.partialorder %v1341_v16, 0.0 }
 0x9ee   :  { %v1344_v21 = vmul.f32 0.2, %v1340_v18  ;;  %vm1342_vm15 = vcmp.gt.f32.partialorder %v1340_v18, 0.0 }
 0x9ef   :  { %v1281_v34 = vpop.permute.xlu1 %1280  ;;  %v1347_v22 = vsel %vm1343_vm14, %v1341_v16, %v1345_v19 }
 0x9f0   :  { %v1292_v23 = vadd.f32 %v1291_v20, %v1281_v34  ;;  %v1286_v24 = vpop.permute.xlu0 %1285  ;;  %v1349_v33 = vsel %vm521_vm10, %v1347_v22, -1e+30  ;;  %v1346_v25 = vsel %vm1342_vm15, %v1340_v18, %v1344_v21  ;;  %v1596_v21 = vld [vmem:[%s2319_s0 + $0x130] ss:$0 sm:$0xff] }
 0x9f1   :  { %v1293_v42 = vadd.f32 %v1291_v20, %v1286_v24  ;;  %v1353_v32 = vsel %vm524_vm4, %v1349_v33, -inf  ;;  %v1348_v35 = vsel %vm520_vm7, %v1346_v25, -1e+30 }
 0x9f2   :  { %v1296_v36 = vmul.f32 0.2, %v1292_v23  ;;  %1354 = vmax.xlane.f32.xlu0 %v1353_v32  ;;  %v1350_v40 = vsel %vm524_vm4, %v1348_v35, -inf  ;;  %vm1294_vm0 = vcmp.gt.f32.partialorder %v1292_v23, 0.0 }
 0x9f3   :  { %v1297_v41 = vmul.f32 0.2, %v1293_v42  ;;  %1351 = vmax.xlane.f32.xlu1 %v1350_v40  ;;  %vm1295_vm1 = vcmp.gt.f32.partialorder %v1293_v42, 0.0 }
 0x9f4   :  { %v1298_v37 = vsel %vm1294_vm0, %v1292_v23, %v1296_v36 }
 0x9f5   :  { %v1300_v38 = vsel %vm520_vm7, %v1298_v37, -1e+30  ;;  %v1299_v39 = vsel %vm1295_vm1, %v1293_v42, %v1297_v41 }
 0x9f6   :  { %v1302_v43 = vsel %vm524_vm4, %v1300_v38, -inf  ;;  %v1301_v44 = vsel %vm521_vm10, %v1299_v39, -1e+30 }
 0x9f7   :  { %1303 = vmax.xlane.f32.xlu1 %v1302_v43  ;;  %v1305_v46 = vsel %vm524_vm4, %v1301_v44, -inf }
 0x9f8   :  { %1306 = vmax.xlane.f32.xlu0 %v1305_v46 }
 0xa7f   :  { %v1355_v47 = vpop.xlane.xlu0 %1354 }
 0xa80   :  { %v1357_v48 = vsub.f32 %v1349_v33, %v1355_v47  ;;  %v1352_v49 = vpop.xlane.xlu1 %1351 }
 0xa81   :  { %v1356_v51 = vsub.f32 %v1348_v35, %v1352_v49 }
 0xa82   :  { %v1360_v52 = vmul.f32 1.442695, %v1357_v48 }
 0xa83   :  { %v1358_v53 = vmul.f32 1.442695, %v1356_v51 }
 0xa84   :  { %1966 = vpow2.f32 %v1360_v52  ;;  %v1304_v54 = vpop.xlane.xlu1 %1303 }
 0xa85   :  { %1968 = vpow2.f32 %v1358_v53  ;;  %v1308_v55 = vsub.f32 %v1300_v38, %v1304_v54  ;;  %v1307_v56 = vpop.xlane.xlu0 %1306 }
 0xa86   :  { %v1309_v28 = vsub.f32 %v1301_v44, %v1307_v56 }
 0xa87   :  { %v1310_v29 = vmul.f32 1.442695, %v1308_v55 }
 0xa88   :  { %v1312_v30 = vmul.f32 1.442695, %v1309_v28 }
 0xa89   :  { %1970 = vpow2.f32 %v1310_v29 }
 0xa8a   :  { %1972 = vpow2.f32 %v1312_v30 }
 0xa8e   :  { %v1967_v57 = vpop.eup %1966 }
 0xa8f   :  { %v1969_v58 = vpop.eup %1968  ;;  %v1363_v59 = vsel %vm521_vm10, %v1967_v57, 0.0 }
 0xa90   :  { %v1367_v60 = vsel %vm524_vm4, %v1363_v59, 0.0  ;;  %v1362_v61 = vsel %vm520_vm7, %v1969_v58, 0.0 }
 0xa91   :  { %1368 = vadd.xlane.f32.xlu0 %v1367_v60  ;;  %v1364_v62 = vsel %vm524_vm4, %v1362_v61, 0.0 }
 0xa92   :  { %1365 = vadd.xlane.f32.xlu1 %v1364_v62 }
 0xa93   :  { %v1971_v31 = vpop.eup %1970 }
 0xa94   :  { %v1973_v26 = vpop.eup %1972  ;;  %v1314_v63 = vsel %vm520_vm7, %v1971_v31, 0.0 }
 0xa95   :  { %v1316_v27 = vsel %vm524_vm4, %v1314_v63, 0.0  ;;  %v1315_v0 = vsel %vm521_vm10, %v1973_v26, 0.0 }
 0xa96   :  { %1317 = vadd.xlane.f32.xlu1 %v1316_v27  ;;  %v1319_v1 = vsel %vm524_vm4, %v1315_v0, 0.0 }
 0xa97   :  { %1320 = vadd.xlane.f32.xlu0 %v1319_v1 }
 0xaa7   :  { %1945 = vrot.lane.b32.xlu1 %v1944_v7, %s1988_s29 }
 0xb1e   :  { %v1369_v2 = vpop.xlane.xlu0 %1368 }
 0xb1f   :  { %v1371_v3 = vmul.f32 2.0, %v1369_v2  ;;  %v1366_v4 = vpop.xlane.xlu1 %1365 }
 0xb20   :  { %v1370_v9 = vmul.f32 2.0, %v1366_v4 }
 0xb21   :  { %1974 = vrcp.f32 %v1371_v3 }
 0xb22   :  { %1976 = vrcp.f32 %v1370_v9 }
 0xb23   :  { %v1318_v45 = vpop.xlane.xlu1 %1317 }
 0xb24   :  { %v1322_v10 = vmul.f32 2.0, %v1318_v45  ;;  %v1321_v11 = vpop.xlane.xlu0 %1320 }
 0xb25   :  { %v1323_v50 = vmul.f32 2.0, %v1321_v11 }
 0xb26   :  { %1978 = vrcp.f32 %v1322_v10 }
 0xb27   :  { %v1946_v12 = vpop.permute.xlu1 %1945  ;;  %1980 = vrcp.f32 %v1323_v50 }
 0xb28   :  { %v1948_v13 = vunpack.i.h.bf16 %v1946_v12  ;;  %v1947_v14 = vunpack.i.l.bf16 %v1946_v12 }
 0xb2a   :  { %v1913_v15 = vpack.c.bf16 %v1948_v13, %v1947_v14 }
 0xb2b   :  { %v1975_v16 = vpop.eup %1974 }
 0xb2c   :  { %v1977_v17 = vpop.eup %1976  ;;  %1914 = vmatprep.subr.bf16.mxu0 %v1913_v15  ;;  %v1375_v6 = vmul.f32 %v1975_v16, %v1363_v59 }
 0xb2d   :  { %1916 = vmatpush3.bf16.msra.mxu0 %v1913_v15  ;;  %v1374_v5 = vmul.f32 %v1977_v17, %v1362_v61 }
 0xb2e   :  { %1918 = vmatprep.subr.bf16.mxu0 %v2257_v8 }
 0xb2f   :  { %1819 = vmatprep.mubr.msk.f32.mxu0 %vm524_vm4, %v1374_v5 }
 0xb30   :  { %v1979_v7 = vpop.eup %1978  ;;  %1820 = vmatmul.mubr.msk.f32.vlgmr.msra.gmra.mrb[10].mxu0 %vm524_vm4, %v1375_v6 }
 0xb31   :  { %1920 = vmatpush3.bf16.msra.mxu0 %v2257_v8  ;;  %v1326_v18 = vmul.f32 %v1979_v7, %v1314_v63  ;;  %v1981_v19 = vpop.eup %1980 }
 0xb32   :  { %v1327_v20 = vmul.f32 %v1981_v19, %v1315_v0 }
 0xb33   :  { %1826 = vmatprep.mubr.msk.f32.mxu0 %vm524_vm4, %v1326_v18 }
 0xb38   :  { %1827 = vmatmul.mubr.msk.f32.vlgmr.msra.gmra.mrb[10].mxu0 %vm524_vm4, %v1327_v20 }
 0xc0b   :  { %v1828_v34 = vpop.f32.mrb[10].mxu0 }
 0xc0c   :  { %v1550_v22 = vadd.f32 %v1828_v34, %v1596_v21  ;;  %v1535_v23 = vpop.f32.mrb[11].mxu0 }
 0xc0d   :  { %v1549_v24 = vadd.f32 %v1596_v21, %v1535_v23 }
 0xc0e   :  { %1552 = vst.msk [vmem:[%s2321_s2 + $0x8] sm:$0xff] %vm348_vm3, %v1550_v22 }
 0xc0f   :  { %1551 = vst.msk [vmem:[%s2321_s2] sm:$0xff] %vm348_vm3, %v1549_v24 }

</bundles_post_ra>
